<compile_context>
chip_gen: v7x
topology: tpu7x:2x2x1
jax: 0.10.0
libtpu: 0.0.40
codegen_flags: <defaults>
</compile_context>

<pallas_src>
import jax
import jax.numpy as jnp
from jax.experimental import pallas as pl
from jax.experimental.pallas import tpu as pltpu

_HIGHEST = jax.lax.Precision.HIGHEST
_CHUNK = 512  # inner lane-chunk: keeps ~<50 live vregs, no spills


def _round_up(n: int, m: int) -> int:
    return ((n + m - 1) // m) * m


def _make_kernel(chunk: int, n_chunks: int):
    def kernel(x_ref, w1_ref, b1_ref, w2_ref, b2_ref, w3_ref, b3_ref, o_ref):
        # x_ref: [2, TB]  (features on sublanes, batch on lanes);  o_ref: [1, TB]
        w1 = w1_ref[...]                                   # [10, 2]
        w2 = w2_ref[...]                                   # [10, 10]
        w3 = w3_ref[...]                                   # [1, 10]
        # Hoisted bias broadcasts (done once per grid step, not per chunk).
        b1 = jnp.broadcast_to(b1_ref[...], (10, chunk))
        b2 = jnp.broadcast_to(b2_ref[...], (10, chunk))
        b3 = jnp.broadcast_to(b3_ref[...], (1, chunk))

        @pl.loop(0, n_chunks)
        def _(c):
            start = pl.multiple_of(c * chunk, chunk)
            xc = x_ref[:, pl.ds(start, chunk)]             # [2, chunk]
            # layer1 on the MXU (K=2), f32-exact via HIGHEST precision.
            h1 = jnp.dot(w1, xc, preferred_element_type=jnp.float32,
                         precision=_HIGHEST) + b1
            h1 = jnp.maximum(h1, 0.0)                      # [10, chunk]
            # layer2 on the MXU (10x10).
            h2 = jnp.dot(w2, h1, preferred_element_type=jnp.float32,
                         precision=_HIGHEST) + b2
            h2 = jnp.maximum(h2, 0.0)                      # [10, chunk]
            # layer3 on the MXU (M=1) -- no cross-sublane XLU reduce.
            y = jnp.dot(w3, h2, preferred_element_type=jnp.float32,
                        precision=_HIGHEST) + b3           # [1, chunk]
            o_ref[:, pl.ds(start, chunk)] = y.astype(o_ref.dtype)

    return kernel


def or_model_forward(x, params, *, max_tile_b: int = 128 * 1024):
    """x: [B, 2] float32 -> [B, 1] float32."""
    w1, b1, w2, b2, w3, b3 = params
    B = x.shape[0]

    # TODO(synk): accepting feature-major [2, B] input (and emitting [1, B])
    # upstream would remove this HBM->HBM transpose pass; the kernel itself is
    # already mem-bound at large tiles.
    xt = x.astype(jnp.float32).T                           # [2, B]

    # Batch-tile selection: lane tile, multiple of the inner chunk.
    max_tile_b = max(_CHUNK, (max_tile_b // _CHUNK) * _CHUNK)
    b128 = _round_up(B, 128)
    if b128 <= _CHUNK:
        tb = b128
    else:
        tb = min(max_tile_b, _round_up(b128, _CHUNK))
        # v7x megacore: keep >= 2 grid steps when the batch is big enough.
        if tb >= b128 and b128 >= 2 * _CHUNK:
            tb = _round_up(pl.cdiv(b128, 2), _CHUNK)
    chunk = min(_CHUNK, tb)
    n_chunks = tb // chunk
    bp = _round_up(B, tb)
    if bp != B:
        xt = jnp.pad(xt, ((0, 0), (0, bp - B)))
    grid = (bp // tb,)

    resident = lambda a: pl.BlockSpec(a.shape, lambda i: (0,) * a.ndim)

    # Mem-bound kernel: ~12 bytes and ~300 flops per example, no transcendentals.
    cost = pl.CostEstimate(flops=300 * bp, transcendentals=0,
                           bytes_accessed=12 * bp + 640)

    out = pl.pallas_call(
        _make_kernel(chunk, n_chunks),
        out_shape=jax.ShapeDtypeStruct((1, bp), jnp.float32),
        grid=grid,
        in_specs=[
            pl.BlockSpec((2, tb), lambda i: (0, i)),       # x tile (pipelined)
            resident(w1), resident(b1),                    # tiny weights stay put
            resident(w2), resident(b2),
            resident(w3), resident(b3),
        ],
        out_specs=pl.BlockSpec((1, tb), lambda i: (0, i)),
        compiler_params=pltpu.CompilerParams(
            dimension_semantics=("parallel",),             # shard batch over TCs
            vmem_limit_bytes=48 * 1024 * 1024,             # big tile > v5e 16MiB default
        ),
        cost_estimate=cost,
    )(xt, w1, b1, w2, b2, w3, b3)

    return out[:, :B].T                                    # back to [B, 1]


def init_params(key):
    """Deterministic init matching PyTorch nn.Linear defaults.

    Kernel-ready layouts:
      w1 [10, 2]  b1 [10, 1]
      w2 [10, 10] b2 [10, 1]
      w3 [1, 10]  b3 [1, 1]   (PyTorch [out, in] layout kept as-is)
    """
    def linear(k, fan_in, fan_out):
        kw, kb = jax.random.split(k)
        bound = 1.0 / float(fan_in) ** 0.5
        w = jax.random.uniform(kw, (fan_out, fan_in), jnp.float32, -bound, bound)
        b = jax.random.uniform(kb, (fan_out, 1), jnp.float32, -bound, bound)
        return w, b

    k1, k2, k3 = jax.random.split(key, 3)
    w1, b1 = linear(k1, 2, 10)     # layer1: Linear(2, 10)
    w2, b2 = linear(k2, 10, 10)    # layer2: Linear(10, 10)
    w3, b3 = linear(k3, 10, 1)     # layer3: Linear(10, 1)
    return (w1, b1, w2, b2, w3, b3)


def reference_forward(x, params):
    """Pure-JAX reference of the PyTorch forward pass (f32-exact matmuls)."""
    w1, b1, w2, b2, w3, b3 = params
    h = jnp.maximum(jnp.dot(x, w1.T, precision=_HIGHEST) + b1.T, 0.0)
    h = jnp.maximum(jnp.dot(h, w2.T, precision=_HIGHEST) + b2.T, 0.0)
    return jnp.dot(h, w3.T, precision=_HIGHEST) + b3.T


# TODO(synk): OrModel.train/predict/save/load are host-side training/IO
# utilities, not part of the forward pass, and are intentionally not ported.

if __name__ == "__main__":
    key = jax.random.PRNGKey(0)
    kx, kp = jax.random.split(key)

    B = 8
    x = jax.random.normal(kx, (B, 2), dtype=jnp.float32)
    params = init_params(kp)

    out = or_model_forward(x, params)
    jax.block_until_ready(out)

    ref = reference_forward(x, params)
    assert out.shape == (B, 1), out.shape
    assert jnp.allclose(out, ref, atol=1e-5, rtol=1e-5), (out, ref)

    print("KERNEL_OK")
</pallas_src>

<mosaic_0001>
module attributes {stable_mosaic.version = 11 : i64} {
  func.func @kernel(%arg0: i32, %arg1: memref<2x128xf32, #tpu.memory_space<vmem>>, %arg2: memref<10x2xf32, #tpu.memory_space<vmem>>, %arg3: memref<10x1xf32, #tpu.memory_space<vmem>>, %arg4: memref<10x10xf32, #tpu.memory_space<vmem>>, %arg5: memref<10x1xf32, #tpu.memory_space<vmem>>, %arg6: memref<1x10xf32, #tpu.memory_space<vmem>>, %arg7: memref<1x1xf32, #tpu.memory_space<vmem>>, %arg8: memref<1x128xf32, #tpu.memory_space<vmem>>) attributes {dimension_semantics = [#tpu.dimension_semantics<parallel>], iteration_bounds = array<i64: 1>, scalar_prefetch = 0 : i64, scratch_operands = 0 : i64, tpu.core_type = #tpu.core_type<tc>, window_params = [{transform_indices = @transform_0, window_bounds = array<i64: 2, 128>}, {pipeline_mode = #tpu.pipeline_mode<synchronous>, transform_indices = @transform_1, window_bounds = array<i64: 10, 2>}, {pipeline_mode = #tpu.pipeline_mode<synchronous>, transform_indices = @transform_2, window_bounds = array<i64: 10, 1>}, {pipeline_mode = #tpu.pipeline_mode<synchronous>, transform_indices = @transform_3, window_bounds = array<i64: 10, 10>}, {pipeline_mode = #tpu.pipeline_mode<synchronous>, transform_indices = @transform_4, window_bounds = array<i64: 10, 1>}, {pipeline_mode = #tpu.pipeline_mode<synchronous>, transform_indices = @transform_5, window_bounds = array<i64: 1, 10>}, {pipeline_mode = #tpu.pipeline_mode<synchronous>, transform_indices = @transform_6, window_bounds = array<i64: 1, 1>}, {transform_indices = @transform_7, window_bounds = array<i64: 1, 128>}]} {
    %c0 = arith.constant 0 : index
    %c0_0 = arith.constant 0 : index
    %0 = vector.load %arg2[%c0, %c0_0] : memref<10x2xf32, #tpu.memory_space<vmem>>, vector<10x2xf32>
    %c0_1 = arith.constant 0 : index
    %c0_2 = arith.constant 0 : index
    %1 = vector.load %arg4[%c0_1, %c0_2] : memref<10x10xf32, #tpu.memory_space<vmem>>, vector<10x10xf32>
    %c0_3 = arith.constant 0 : index
    %c0_4 = arith.constant 0 : index
    %2 = vector.load %arg6[%c0_3, %c0_4] : memref<1x10xf32, #tpu.memory_space<vmem>>, vector<1x10xf32>
    %c0_5 = arith.constant 0 : index
    %c0_6 = arith.constant 0 : index
    %3 = vector.load %arg3[%c0_5, %c0_6] : memref<10x1xf32, #tpu.memory_space<vmem>>, vector<10x1xf32>
    %4 = vector.shape_cast %3 : vector<10x1xf32> to vector<10x1xf32>
    %5 = vector.broadcast %4 : vector<10x1xf32> to vector<10x128xf32>
    %c0_7 = arith.constant 0 : index
    %c0_8 = arith.constant 0 : index
    %6 = vector.load %arg5[%c0_7, %c0_8] : memref<10x1xf32, #tpu.memory_space<vmem>>, vector<10x1xf32>
    %7 = vector.shape_cast %6 : vector<10x1xf32> to vector<10x1xf32>
    %8 = vector.broadcast %7 : vector<10x1xf32> to vector<10x128xf32>
    %c0_9 = arith.constant 0 : index
    %c0_10 = arith.constant 0 : index
    %9 = vector.load %arg7[%c0_9, %c0_10] : memref<1x1xf32, #tpu.memory_space<vmem>>, vector<1x1xf32>
    %10 = vector.shape_cast %9 : vector<1x1xf32> to vector<1x1xf32>
    %11 = vector.broadcast %10 : vector<1x1xf32> to vector<1x128xf32>
    %c0_i32 = arith.constant 0 : i32
    %c1_i32 = arith.constant 1 : i32
    %12 = arith.muli %c0_i32, %c1_i32 : i32
    %c0_i32_11 = arith.constant 0 : i32
    %13 = arith.addi %c0_i32_11, %12 : i32
    %c128_i32 = arith.constant 128 : i32
    %14 = arith.muli %13, %c128_i32 : i32
    %15 = tpu.assume_multiple %14, 128 : i32
    %c0_12 = arith.constant 0 : index
    %16 = arith.index_cast %15 : i32 to index
    %17 = vector.load %arg1[%c0_12, %16] : memref<2x128xf32, #tpu.memory_space<vmem>>, vector<2x128xf32>
    %cst = arith.constant dense<0.000000e+00> : vector<10x128xf32>
    %18 = tpu.matmul %0, %17, %cst {dimension_numbers = #tpu.dot_dimension_numbers<[1], [0], [0], [1], [0, 0, 1, 1], [], []>, precision = #tpu.contract_precision<fp32>} : vector<10x2xf32>, vector<2x128xf32>, vector<10x128xf32> -> vector<10x128xf32>
    %19 = arith.addf %18, %5 : vector<10x128xf32>
    %cst_13 = arith.constant 0.000000e+00 : f32
    %20 = vector.broadcast %cst_13 : f32 to vector<10x128xf32>
    %21 = arith.maximumf %19, %20 : vector<10x128xf32>
    %cst_14 = arith.constant dense<0.000000e+00> : vector<10x128xf32>
    %22 = tpu.matmul %1, %21, %cst_14 {dimension_numbers = #tpu.dot_dimension_numbers<[1], [0], [0], [1], [0, 0, 1, 1], [], []>, precision = #tpu.contract_precision<fp32>} : vector<10x10xf32>, vector<10x128xf32>, vector<10x128xf32> -> vector<10x128xf32>
    %23 = arith.addf %22, %8 : vector<10x128xf32>
    %cst_15 = arith.constant 0.000000e+00 : f32
    %24 = vector.broadcast %cst_15 : f32 to vector<10x128xf32>
    %25 = arith.maximumf %23, %24 : vector<10x128xf32>
    %cst_16 = arith.constant dense<0.000000e+00> : vector<1x128xf32>
    %26 = tpu.matmul %2, %25, %cst_16 {dimension_numbers = #tpu.dot_dimension_numbers<[1], [0], [0], [1], [0, 0, 1, 1], [], []>, precision = #tpu.contract_precision<fp32>} : vector<1x10xf32>, vector<10x128xf32>, vector<1x128xf32> -> vector<1x128xf32>
    %27 = arith.addf %26, %11 : vector<1x128xf32>
    %c0_17 = arith.constant 0 : index
    %28 = arith.index_cast %15 : i32 to index
    %29 = vector.load %arg8[%c0_17, %28] : memref<1x128xf32, #tpu.memory_space<vmem>>, vector<1x128xf32>
    tpu.vector_store %arg8[%c0_17, %28], %27 {strides = array<i32>} : memref<1x128xf32, #tpu.memory_space<vmem>>, vector<1x128xf32>,
    %c1_i32_18 = arith.constant 1 : i32
    return
  }
  func.func @transform_0(%arg0: i32) -> (i32, i32) {
    %c0_i32 = arith.constant 0 : i32
    %c0_i32_0 = arith.constant 0 : i32
    return %c0_i32, %arg0 : i32, i32
  }
  func.func @transform_1(%arg0: i32) -> (i32, i32) {
    %c0_i32 = arith.constant 0 : i32
    %c0_i32_0 = arith.constant 0 : i32
    %c0_i32_1 = arith.constant 0 : i32
    return %c0_i32, %c0_i32_0 : i32, i32
  }
  func.func @transform_2(%arg0: i32) -> (i32, i32) {
    %c0_i32 = arith.constant 0 : i32
    %c0_i32_0 = arith.constant 0 : i32
    %c0_i32_1 = arith.constant 0 : i32
    return %c0_i32, %c0_i32_0 : i32, i32
  }
  func.func @transform_3(%arg0: i32) -> (i32, i32) {
    %c0_i32 = arith.constant 0 : i32
    %c0_i32_0 = arith.constant 0 : i32
    %c0_i32_1 = arith.constant 0 : i32
    return %c0_i32, %c0_i32_0 : i32, i32
  }
  func.func @transform_4(%arg0: i32) -> (i32, i32) {
    %c0_i32 = arith.constant 0 : i32
    %c0_i32_0 = arith.constant 0 : i32
    %c0_i32_1 = arith.constant 0 : i32
    return %c0_i32, %c0_i32_0 : i32, i32
  }
  func.func @transform_5(%arg0: i32) -> (i32, i32) {
    %c0_i32 = arith.constant 0 : i32
    %c0_i32_0 = arith.constant 0 : i32
    %c0_i32_1 = arith.constant 0 : i32
    return %c0_i32, %c0_i32_0 : i32, i32
  }
  func.func @transform_6(%arg0: i32) -> (i32, i32) {
    %c0_i32 = arith.constant 0 : i32
    %c0_i32_0 = arith.constant 0 : i32
    %c0_i32_1 = arith.constant 0 : i32
    return %c0_i32, %c0_i32_0 : i32, i32
  }
  func.func @transform_7(%arg0: i32) -> (i32, i32) {
    %c0_i32 = arith.constant 0 : i32
    %c0_i32_0 = arith.constant 0 : i32
    return %c0_i32, %arg0 : i32, i32
  }
}

</mosaic_0001>

<bundles_post_ra>
// kernel: tpu_custom_call.1
= control target key start
LH: loop header
LB: loop body
LE: loop exit
PB: predicated region body
PF: predicated region fallthrough
CT: control target
= control target key end

     0   :  { %s1955_s0 = inlined_call_operand.vmem [shape: f32[2,128], index: 0, kind: input, shape index: {}]   ;;  %s1956_s1 = inlined_call_operand.vmem [shape: f32[10,2], index: 1, kind: input, shape index: {}]   ;;  %s1957_s2 = inlined_call_operand.vmem [shape: f32[10,1], index: 2, kind: input, shape index: {}]   ;;  %s1958_s3 = inlined_call_operand.vmem [shape: f32[10,10], index: 3, kind: input, shape index: {}]   ;;  %s1959_s4 = inlined_call_operand.vmem [shape: f32[10,1], index: 4, kind: input, shape index: {}]   ;;  %s1960_s5 = inlined_call_operand.vmem [shape: f32[1,10], index: 5, kind: input, shape index: {}]   ;;  %s1961_s6 = inlined_call_operand.<no memory space> [shape: f32[1,1], index: 6, kind: input, shape index: {}]   ;;  %s1962_s7 = inlined_call_operand.hbm [shape: f32[1,128], index: 7, kind: output, shape index: {}]  }
   0x1   :  { %v12_v0 = vstv %s1961_s6 }
   0x2   :  { %13 = vst [vmem:[#allocation2] sm:$0x1] %v12_v0 }
   0x3   :  { %v68_v1 = vld [vmem:[%s1955_s0] sm:$0x3]  ;;  %vm76_vm0 = vcmask 1041408   ;;  %v30_v3 = vld [vmem:[%s1956_s1 + $0x8] sm:$0x3]  ;;  %vm69_vm1 = vcmask 15360  }
   0x4   :  { %v29_v2 = vld [vmem:[%s1956_s1] sm:$0xff]  ;;  %v78_v4 = vsel %vm76_vm0, %v68_v1, 0  ;;  %v35_v5 = vld [vmem:[%s1957_s2 + $0x8] sm:$0x3]  ;;  %v74_v8 = vsel %vm69_vm1, %v30_v3, 0  ;;  %v1847_v9 = vmov 0  }
   0x5   :  { %v81_v6 = vand.u32 4294901760, %v78_v4  ;;  %v71_v7 = vsel %vm69_vm1, %v29_v2, 0  ;;  %1821 = vset.pattern.permute.xlu0 %v1847_v9  ;;  %1822 = vset.pattern.permute.xlu1 %v1847_v9  ;;  %v156_v11 = vand.u32 4294901760, %v74_v8 }
   0x6   :  { %v146_v10 = vand.u32 4294901760, %v71_v7  ;;  %43 = vperm.xlu0 %1821, %v35_v5  }
   0x7   :  { %14 = vsyncpa [#allocation4], 0  ;;  %1640 = vmatprep.subr.mxu0 %v81_v6  ;;  %1625 = vmatprep.subr.mxu1 %v81_v6  ;;  %v168_v12 = vsub.f32 %v78_v4, %v81_v6  ;;  %v34_v13 = vld [vmem:[%s1957_s2] sm:$0xff]  ;;  %v157_v15 = vsub.f32 %v74_v8, %v156_v11  ;;  %vm571_vm2 = vcmask 80896   ;;  %v47_v33 = vld [vmem:[%s1959_s4 + $0x8] sm:$0x3] }
   0x8   :  { %1641 = vmatpush3.msra.mxu0 %v81_v6  ;;  %v147_v14 = vsub.f32 %v71_v7, %v146_v10  ;;  %1626 = vmatpush3.msra.mxu1 %v81_v6  ;;  %v31_v26 = vld [vmem:[%s1958_s3] sm:$0xff]  ;;  %v32_v35 = vld [vmem:[%s1958_s3 + $0x8] sm:$0x3]  ;;  %v1848_v5 = vmov 0.0|0.0   ;;  %vm1849_vm3 = vmmov 0  }
   0x9   :  { %v169_v16 = vand.u32 4294901760, %v168_v12  ;;  %v158_v18 = vand.u32 4294901760, %v157_v15  ;;  %v58_v23 = vld [vmem:[#allocation2] sm:$0x1]  ;;  %v573_v27 = vsel %vm571_vm2, %v31_v26, 0  ;;  %55 = vperm.xlu1 %1822, %v47_v33   ;;  %v576_v36 = vsel %vm571_vm2, %v32_v35, 0 }
   0xa   :  { %v148_v17 = vand.u32 4294901760, %v147_v14  ;;  %38 = vperm.xlu0 %1821, %v34_v13   ;;  %v1915_v28 = vand.u32 4294901760, %v573_v27  ;;  %v46_v34 = vld [vmem:[%s1959_s4] sm:$0xff]  ;;  %v658_v39 = vand.u32 4294901760, %v576_v36 }
   0xb   :  { %1645 = vmatprep.subr.mxu0 %v169_v16  ;;  %v170_v19 = vsub.f32 %v168_v12, %v169_v16  ;;  %v159_v21 = vsub.f32 %v157_v15, %v158_v18  ;;  %v33_v7 = vld [vmem:[%s1960_s5] sm:$0x1]  ;;  %s1851_s5 = smov [#allocation3]  }
   0xc   :  { %1642 = vmatprep.mubr.f32.mxu0 %v148_v17  ;;  %v149_v20 = vsub.f32 %v147_v14, %v148_v17  ;;  %v649_v29 = vsub.f32 %v573_v27, %v1915_v28  ;;  %v659_v42 = vsub.f32 %v576_v36, %v658_v39  ;;  %v1086_v8 = vsel %vm571_vm2, %v33_v7, 0  ;;  %s1557_s17 = sshll.u32 %s1851_s5, 4  ;;  %s1558_s17 = int_to_ptr.vmem [resolvable:$true] %s1557_s17 }
   0xd   :  { %1643 = vmatmul.mubr.f32.vlgmr.msra.gmra.mrb[0].mxu0 %v158_v18  ;;  %v171_v22 = vand.u32 4294901760, %v170_v19  ;;  %v160_v25 = vand.u32 4294901760, %v159_v21  ;;  %50 = vperm.xlu1 %1822, %v46_v34   ;;  %v1158_v9 = vand.u32 4294901760, %v1086_v8  ;;  %s1823_s18 = scalar_lea.vmem %s1558_s17, 16  ;;  %s1827_s19 = scalar_lea.vmem %s1558_s17, 32 }
   0xe   :  { %v150_v24 = vand.u32 4294901760, %v149_v20  ;;  %1646 = vmatpush3.msra.mxu0 %v169_v16  ;;  %1647 = vmatprep.mubr.f32.mxu0 %v146_v10  ;;  %v650_v30 = vand.u32 4294901760, %v649_v29  ;;  %v660_v49 = vand.u32 4294901760, %v659_v42  ;;  %p1824_p0 = scmp.ne.s32.totalorder %s1558_s17, %s1823_s18  ;;  %p1828_p1 = scmp.lt.s32.totalorder %s1558_s17, %s1558_s17 }
   0xf   :  { %1630 = vmatprep.subr.mxu1 %v171_v22  ;;  %1650 = vmatprep.subr.mxu0 %v81_v6  ;;  %p1829_p2 = scmp.lt.s32.totalorder %s1827_s19, %s1823_s18 }
  0x10   :  { %1627 = vmatprep.mubr.f32.mxu1 %v150_v24  ;;  %61 = vperm.xlu0 %1821, %v58_v23   ;;  %v651_v31 = vsub.f32 %v649_v29, %v650_v30  ;;  %v661_v55 = vsub.f32 %v659_v42, %v660_v49 }
  0x11   :  { %1628 = vmatmul.mubr.f32.vlgmr.msra.gmra.mrb[0].mxu1 %v160_v25  ;;  %p1830_p3 = por %p1829_p2, %p1828_p1 }
  0x12   :  { %1631 = vmatpush3.msra.mxu1 %v171_v22  ;;  %1632 = vmatprep.mubr.f32.mxu1 %v146_v10  ;;  %v652_v32 = vand.u32 4294901760, %v651_v31  ;;  %v662_v59 = vand.u32 4294901760, %v661_v55 }
  0x13   :  { %1635 = vmatprep.subr.mxu1 %v168_v12  ;;  %p1831_p4 = pnand %p1830_p3, %p1824_p0 }
  0x15   :  { %1648 = vmatmul.mubr.f32.vlgmr.msra.gmra.mrb[0].mxu0 %v156_v11 }
  0x16   :  { %1651 = vmatpush3.msra.mxu0 %v81_v6  ;;  %1652 = vmatprep.mubr.f32.mxu0 %v146_v10  ;;  %v1850_v6 = vmov 0.0  }
  0x17   :  { %1763 = vmatprep.subr.bf16.mxu0 %v1848_v5 }
  0x19   :  { %1633 = vmatmul.mubr.f32.vlgmr.msra.gmra.mrb[0].mxu1 %v156_v11 }
  0x1a   :  { %1636 = vmatpush3.msra.mxu1 %v168_v12  ;;  %1637 = vmatprep.mubr.f32.mxu1 %v147_v14 }
  0x1d   :  { %1653 = vmatmul.mubr.f32.vlgmr.msra.gmra.mrb[0].mxu0 %v156_v11  ;;  %v1159_v11 = vsub.f32 %v1086_v8, %v1158_v9 }
  0x1e   :  { %1701 = vmatprep.mubr.msk.f32.mxu0 %vm1849_vm3, %v1850_v6 }
  0x1f   :  { %v1160_v16 = vand.u32 4294901760, %v1159_v11 }
  0x21   :  { %1638 = vmatmul.mubr.f32.vlgmr.msra.gmra.mrb[0].mxu1 %v157_v15  ;;  %v1161_v21 = vsub.f32 %v1159_v11, %v1160_v16 }
  0x22   :  { %1659 = vmatprep.mubr.f32.mxu1 %v652_v32 }
  0x23   :  { %v1162_v27 = vand.u32 4294901760, %v1161_v21 }
  0x85   :  { %v44_v37 = vpop.permute.xlu0 %43 }
  0x88   :  { %v56_v10 = vpop.permute.xlu1 %55 }
  0x89   :  { %v39_v43 = vpop.permute.xlu0 %38 }
  0x8c   :  { %v51_v13 = vpop.permute.xlu1 %50 }
  0xf0   :  { %v1654_v38 = vpop.f32.mrb[0].mxu0 }
  0xf1   :  { %v559_v40 = vpop.f32.mrb[1].mxu0 }
  0xf4   :  { %v1639_v41 = vpop.f32.mrb[0].mxu1 }
  0xf5   :  { %v1781_v44 = vadd.f32 %v1639_v41, %v44_v37  ;;  %v318_v45 = vpop.f32.mrb[1].mxu1  ;;  %v64_v37 = vlaneseq }
  0xf6   :  { %v1783_v46 = vadd.f32 %v318_v45, %v39_v43 }
  0xf7   :  { %v1782_v47 = vadd.f32 %v1781_v44, %v1654_v38  ;;  %v65_v38 = vshrl.u32 %v64_v37, 7 }
  0xf8   :  { %v1784_v48 = vadd.f32 %v1783_v46, %v559_v40  ;;  %v62_v40 = vpop.permute.xlu0 %61 }
  0xf9   :  { %v570_v50 = vmax.f32 %v1782_v47, 0.0 }
  0xfa   :  { %v569_v51 = vmax.f32 %v1784_v48, 0.0 }
  0xfb   :  { %v579_v52 = vsel %vm76_vm0, %v570_v50, 0 }
  0xfc   :  { %v585_v53 = vand.u32 4294901760, %v579_v52  ;;  %v582_v54 = vand.u32 4294901760, %v569_v51 }
  0xfe   :  { %v677_v56 = vsub.f32 %v579_v52, %v585_v53  ;;  %v1739_v57 = vpack.c.bf16 %v585_v53, %v582_v54  ;;  %v670_v58 = vsub.f32 %v569_v51, %v582_v54 }
 0x100   :  { %1740 = vmatprep.subr.bf16.mxu1 %v1739_v57  ;;  %v671_v60 = vand.u32 4294901760, %v670_v58  ;;  %v678_v61 = vand.u32 4294901760, %v677_v56  ;;  %v1747_v62 = vpack.c.bf16 %v677_v56, %v670_v58 }
 0x101   :  { %1742 = vmatpush3.bf16.msra.mxu1 %v1739_v57 }
 0x102   :  { %v672_v63 = vsub.f32 %v670_v58, %v671_v60  ;;  %v679_v0 = vsub.f32 %v677_v56, %v678_v61  ;;  %v1755_v1 = vpack.c.bf16 %v678_v61, %v671_v60 }
 0x104   :  { %1660 = vmatmul.mubr.f32.vlgmr.msra.gmra.mrb[2].mxu1 %v662_v59  ;;  %v673_v2 = vand.u32 4294901760, %v672_v63  ;;  %v680_v3 = vand.u32 4294901760, %v679_v0 }
 0x105   :  { %1666 = vmatprep.mubr.f32.mxu1 %v1915_v28 }
 0x106   :  { %v1743_v4 = vpack.c.bf16 %v680_v3, %v673_v2 }
 0x108   :  { %1744 = vmatprep.subr.bf16.mxu1 %v1743_v4 }
 0x109   :  { %1746 = vmatpush3.bf16.msra.mxu1 %v1743_v4 }
 0x10a   :  { %1748 = vmatprep.subr.bf16.mxu1 %v1747_v62 }
 0x10c   :  { %1667 = vmatmul.mubr.f32.vlgmr.msra.gmra.mrb[2].mxu1 %v658_v39 }
 0x10d   :  { %1750 = vmatpush3.bf16.msra.mxu1 %v1747_v62  ;;  %1673 = vmatprep.mubr.f32.mxu1 %v649_v29 }
 0x10e   :  { %1752 = vmatprep.subr.bf16.mxu1 %v1739_v57 }
 0x114   :  { %1674 = vmatmul.mubr.f32.vlgmr.msra.gmra.mrb[2].mxu1 %v659_v42 }
 0x115   :  { %1754 = vmatpush3.bf16.msra.mxu1 %v1739_v57  ;;  %1680 = vmatprep.mubr.f32.mxu1 %v650_v30 }
 0x116   :  { %1756 = vmatprep.subr.bf16.mxu1 %v1755_v1 }
 0x11c   :  { %1681 = vmatmul.mubr.f32.vlgmr.msra.gmra.mrb[2].mxu1 %v660_v49 }
 0x11d   :  { %1758 = vmatpush3.bf16.msra.mxu1 %v1755_v1  ;;  %1687 = vmatprep.mubr.f32.mxu1 %v1915_v28 }
 0x11e   :  { %1760 = vmatprep.subr.bf16.mxu1 %v1739_v57 }
 0x124   :  { %1688 = vmatmul.mubr.f32.vlgmr.msra.gmra.mrb[2].mxu1 %v658_v39 }
 0x125   :  { %1762 = vmatpush3.bf16.msra.mxu1 %v1739_v57  ;;  %1694 = vmatprep.mubr.f32.mxu1 %v1915_v28 }
 0x12c   :  { %1695 = vmatmul.mubr.f32.vlgmr.msra.gmra.mrb[2].mxu1 %v658_v39  ;;  %v66_v39 = vsub.s32 0, %v65_v38 }
 0x12e   :  { %v67_v41 = vrot.slane %v62_v40, %v66_v39 }
 0x1ff   :  { %v1696_v12 = vpop.f32.mrb[2].mxu1 }
 0x200   :  { %v1785_v14 = vadd.f32 %v1696_v12, %v56_v10  ;;  %v1073_v15 = vpop.f32.mrb[3].mxu1 }
 0x201   :  { %v1786_v17 = vadd.f32 %v1073_v15, %v51_v13 }
 0x202   :  { %v1084_v18 = vmax.f32 %v1785_v14, 0.0 }
 0x203   :  { %v1083_v19 = vmax.f32 %v1786_v17, 0.0 }
 0x204   :  { %v1089_v20 = vsel %vm76_vm0, %v1084_v18, 0 }
 0x205   :  { %v1095_v22 = vand.u32 4294901760, %v1089_v20  ;;  %v1092_v23 = vand.u32 4294901760, %v1083_v19 }
 0x207   :  { %v1177_v24 = vsub.f32 %v1089_v20, %v1095_v22  ;;  %v1764_v25 = vpack.c.bf16 %v1095_v22, %v1092_v23  ;;  %v1170_v26 = vsub.f32 %v1083_v19, %v1092_v23 }
 0x209   :  { %v1178_v28 = vand.u32 4294901760, %v1177_v24  ;;  %v1171_v29 = vand.u32 4294901760, %v1170_v26  ;;  %1765 = vmatpush3.bf16.msra.mxu0 %v1764_v25  ;;  %v1770_v30 = vpack.c.bf16 %v1177_v24, %v1170_v26 }
 0x20a   :  { %1766 = vmatprep.subr.bf16.mxu0 %v1848_v5 }
 0x20b   :  { %v1179_v31 = vsub.f32 %v1177_v24, %v1178_v28  ;;  %v1172_v32 = vsub.f32 %v1170_v26, %v1171_v29  ;;  %v1776_v33 = vpack.c.bf16 %v1178_v28, %v1171_v29 }
 0x20c   :  { %1702 = vmatmul.mubr.f32.vlgmr.msra.gmra.mrb[2].mxu0 %v1162_v27 }
 0x20d   :  { %v1180_v34 = vand.u32 4294901760, %v1179_v31  ;;  %v1173_v35 = vand.u32 4294901760, %v1172_v32  ;;  %1708 = vmatprep.mubr.msk.f32.mxu0 %vm1849_vm3, %v1850_v6 }
 0x20f   :  { %v1767_v36 = vpack.c.bf16 %v1180_v34, %v1173_v35 }
 0x211   :  { %1768 = vmatpush3.bf16.msra.mxu0 %v1767_v36 }
 0x212   :  { %1769 = vmatprep.subr.bf16.mxu0 %v1848_v5 }
 0x214   :  { %1709 = vmatmul.mubr.f32.vlgmr.msra.gmra.mrb[2].mxu0 %v1158_v9 }
 0x215   :  { %1771 = vmatpush3.bf16.msra.mxu0 %v1770_v30  ;;  %1715 = vmatprep.mubr.msk.f32.mxu0 %vm1849_vm3, %v1850_v6 }
 0x216   :  { %1772 = vmatprep.subr.bf16.mxu0 %v1848_v5 }
 0x21c   :  { %1716 = vmatmul.mubr.f32.vlgmr.msra.gmra.mrb[2].mxu0 %v1159_v11 }
 0x21d   :  { %1774 = vmatpush3.bf16.msra.mxu0 %v1764_v25  ;;  %1722 = vmatprep.mubr.msk.f32.mxu0 %vm1849_vm3, %v1850_v6 }
 0x21e   :  { %1775 = vmatprep.subr.bf16.mxu0 %v1848_v5 }
 0x224   :  { %1723 = vmatmul.mubr.f32.vlgmr.msra.gmra.mrb[2].mxu0 %v1160_v16 }
 0x225   :  { %1777 = vmatpush3.bf16.msra.mxu0 %v1776_v33  ;;  %1729 = vmatprep.mubr.msk.f32.mxu0 %vm1849_vm3, %v1850_v6 }
 0x226   :  { %1778 = vmatprep.subr.bf16.mxu0 %v1848_v5 }
 0x22c   :  { %1730 = vmatmul.mubr.f32.vlgmr.msra.gmra.mrb[2].mxu0 %v1158_v9 }
 0x22d   :  { %1780 = vmatpush3.bf16.msra.mxu0 %v1764_v25  ;;  %1736 = vmatprep.mubr.msk.f32.mxu0 %vm1849_vm3, %v1850_v6 }
 0x234   :  { %1737 = vmatmul.mubr.f32.vlgmr.msra.gmra.mrb[2].mxu0 %v1158_v9 }
 0x307   :  { %v1546_v42 = vpop.f32.mrb[2].mxu0 }
 0x308   :  { %v1787_v43 = vadd.f32 %v1546_v42, %v67_v41  ;;  %v1738_v44 = vpop.f32.mrb[3].mxu0 }
 0x30a   :  { %1550 = vst [vmem:[#allocation3] sm:$0x1] %v1787_v43 }
 0x30b   :  { %1834 = shalt.err (!%p1831_p4)
}
 0x30c   :  { %s1835_s22 = scalar_lea.hbm %s1962_s7, 16 }
 0x30d   :  { %p1836_p5 = scmp.ne.s32.totalorder %s1962_s7, %s1835_s22  ;;  %p1839_p6 = scmp.lt.u32.totalorder %s1835_s22, %s1962_s7 }
 0x30f   :  { %p1841_p7 = pnand %p1839_p6, %p1836_p5 }
 0x311   :  { %1844 = shalt.err (!%p1841_p7)
}
 0x312   :  { %1560 = dma.vmem_to_hbm [thread:$0]  %s1558_s17, 16, %s1962_s7, [#allocation4]  }
 0x313   :  { %1845 = dma.done.wait [#allocation4], 16  }
 0x314   :  { %1846 = vsyncadd [#allocation4], 4294967280 }
 0x315   :  { %1564 = vsyncpa [#allocation4], 1 }

</bundles_post_ra>
